<compile_context>
chip_gen: v7x
topology: tpu7x:2x2x1
jax: 0.10.0
libtpu: 0.0.40
codegen_flags: <defaults>
</compile_context>

<pallas_src>
import jax
import jax.numpy as jnp
from jax.experimental import pallas as pl
from jax.experimental.pallas import tpu as pltpu

_LANE = 128            # lanes (last dim) per vreg
_SUB = 8               # sublanes per f32 vreg
_ROW_ALIGN = 16        # row alignment safe for both f32 and bf16 packing
_VMEM_LIMIT = 32 << 20  # 32 MiB scoped VMEM: safe on v5e/v6e/v7x


def _cdiv(a, b):
    return (a + b - 1) // b


def _round_down(a, m):
    return (a // m) * m


def _make_mse_kernel(block_rows, rows_total, need_mask):
    full_blocks = rows_total // block_rows  # blocks with no partial rows

    def _fold(sq):
        # Fold (block_rows, 128) into one (8, 128) vreg of partial sums via
        # elementwise VPU adds; the expensive cross-lane reduce happens exactly
        # once, in the wrapper.
        return jnp.sum(sq.reshape(block_rows // _SUB, _SUB, _LANE), axis=0)

    def kernel(x_ref, y_ref, out_ref):
        i = pl.program_id(0)

        @pl.when(i == 0)
        def _():
            out_ref[...] = jnp.zeros_like(out_ref)

        d = x_ref[...].astype(jnp.float32) - y_ref[...].astype(jnp.float32)
        sq = d * d

        if not need_mask:
            out_ref[...] += _fold(sq)
        else:
            # Unmasked fast path for all full blocks.
            @pl.when(i < full_blocks)
            def _():
                out_ref[...] += _fold(sq)

            # Only the final (partial) block pays for the mask; build it from
            # a (block_rows, 1) sublane iota and let `where` broadcast lanes.
            @pl.when(i >= full_blocks)
            def _():
                row_start = i * block_rows
                row_ids = row_start + jax.lax.broadcasted_iota(
                    jnp.int32, (block_rows, 1), 0)
                sqm = jnp.where(row_ids < rows_total, sq, 0.0)
                out_ref[...] += _fold(sqm)

    return kernel


def _image_mse_loss(image, image_rec):
    assert image.shape == image_rec.shape, "MSELoss requires matching shapes"
    n = image.size
    x = image.reshape(-1)
    y = image_rec.reshape(-1)

    rows_total = n // _LANE
    if rows_total < _ROW_ALIGN:
        # Tiny input: a kernel launch is pure overhead.
        d = x.astype(jnp.float32) - y.astype(jnp.float32)
        return (jnp.sum(d * d) / jnp.float32(n)).astype(jnp.float32)

    n_main = rows_total * _LANE
    if n_main == n:
        x_main, y_main = x, y                    # zero-copy reshape path
    else:
        x_main, y_main = x[:n_main], y[:n_main]  # lane-aligned prefix
    x2 = x_main.reshape(rows_total, _LANE)
    y2 = y_main.reshape(rows_total, _LANE)

    # Dtype-aware block size: 2 MiB per input buffer per step.
    itemsize = jnp.dtype(x2.dtype).itemsize
    max_block_rows = 4096 if itemsize >= 4 else 8192
    block_rows = min(max_block_rows, _round_down(rows_total, _ROW_ALIGN))
    total_blocks = _cdiv(rows_total, block_rows)
    need_mask = (total_blocks * block_rows) != rows_total

    in_spec = pl.BlockSpec((block_rows, _LANE), lambda i: (i, 0))
    out_spec = pl.BlockSpec((_SUB, _LANE), lambda i: (0, 0))

    kernel = _make_mse_kernel(block_rows, rows_total, need_mask)

    partials = pl.pallas_call(
        kernel,
        out_shape=jax.ShapeDtypeStruct((_SUB, _LANE), jnp.float32),
        grid_spec=pltpu.PrefetchScalarGridSpec(
            num_scalar_prefetch=0,
            grid=(total_blocks,),
            in_specs=[in_spec, in_spec],
            out_specs=out_spec,
        ),
        compiler_params=pltpu.CompilerParams(
            dimension_semantics=("arbitrary",),
            vmem_limit_bytes=_VMEM_LIMIT),
        cost_estimate=pl.CostEstimate(
            flops=3 * n,
            transcendentals=0,
            bytes_accessed=int(2 * n * itemsize + _SUB * _LANE * 4)),
    )(x2, y2)

    total = jnp.sum(partials)                    # single final reduce
    if n_main != n:
        dt = x[n_main:].astype(jnp.float32) - y[n_main:].astype(jnp.float32)
        total = total + jnp.sum(dt * dt)
    return (total / jnp.float32(n)).astype(jnp.float32)


image_mse_loss = jax.jit(_image_mse_loss)


class ImageMSELoss:
    """Mirror of the PyTorch module: holds a (unused-in-forward) weight."""

    def __init__(self, weight: float = 1.0):
        self.weight = weight  # kept for parity; forward does not use it

    def __call__(self, inputs: dict) -> jax.Array:
        return image_mse_loss(inputs["image"], inputs["image_rec"])


if __name__ == "__main__":
    key = jax.random.PRNGKey(0)
    k1, k2 = jax.random.split(key)

    # Small NCHW-shaped images consistent with the module's usage.
    image = jax.random.normal(k1, (2, 4, 16, 16), dtype=jnp.float32)
    image_rec = jax.random.normal(k2, (2, 4, 16, 16), dtype=jnp.float32)

    loss_fn = ImageMSELoss(weight=1.0)
    loss = loss_fn({"image": image, "image_rec": image_rec})
    loss = jax.block_until_ready(loss)

    # Cross-check against plain JAX reference.
    ref = jnp.mean((image - image_rec) ** 2)
    assert jnp.allclose(loss, ref, rtol=1e-5, atol=1e-6), (loss, ref)

    # Extra check: a non-block-aligned, larger input exercising the gated mask
    # and the < 128-element tail path.
    k3, k4 = jax.random.split(k2)
    a = jax.random.normal(k3, (3, 3, 37, 53), dtype=jnp.float32)
    b = jax.random.normal(k4, (3, 3, 37, 53), dtype=jnp.float32)
    out2 = jax.block_until_ready(image_mse_loss(a, b))
    ref2 = jnp.mean((a - b) ** 2)
    assert jnp.allclose(out2, ref2, rtol=1e-5, atol=1e-6), (out2, ref2)

    print("KERNEL_OK")
</pallas_src>

<mosaic_0001>
module attributes {stable_mosaic.version = 11 : i64} {
  func.func @kernel(%arg0: i32, %arg1: memref<16x128xf32, #tpu.memory_space<vmem>>, %arg2: memref<16x128xf32, #tpu.memory_space<vmem>>, %arg3: memref<8x128xf32, #tpu.memory_space<vmem>>) attributes {dimension_semantics = [#tpu.dimension_semantics<arbitrary>], iteration_bounds = array<i64: 1>, scalar_prefetch = 0 : i64, scratch_operands = 0 : i64, tpu.core_type = #tpu.core_type<tc>, window_params = [{transform_indices = @transform_0, window_bounds = array<i64: 16, 128>}, {transform_indices = @transform_1, window_bounds = array<i64: 16, 128>}, {pipeline_mode = #tpu.pipeline_mode<synchronous>, transform_indices = @transform_2, window_bounds = array<i64: 8, 128>}]} {
    %c0_i32 = arith.constant 0 : i32
    %0 = arith.cmpi eq, %arg0, %c0_i32 : i32
    %1 = arith.extui %0 : i1 to i32
    %c0_i32_0 = arith.constant 0 : i32
    %2 = arith.cmpi ne, %1, %c0_i32_0 : i32
    scf.if %2 {
      %cst_8 = arith.constant 0.000000e+00 : f32
      %12 = vector.broadcast %cst_8 : f32 to vector<8x128xf32>
      %c0_9 = arith.constant 0 : index
      %c0_10 = arith.constant 0 : index
      %13 = vector.load %arg3[%c0_9, %c0_10] : memref<8x128xf32, #tpu.memory_space<vmem>>, vector<8x128xf32>
      tpu.vector_store %arg3[%c0_9, %c0_10], %12 {strides = array<i32>} : memref<8x128xf32, #tpu.memory_space<vmem>>, vector<8x128xf32>,
    } else {
    }
    %c0 = arith.constant 0 : index
    %c0_1 = arith.constant 0 : index
    %3 = vector.load %arg1[%c0, %c0_1] : memref<16x128xf32, #tpu.memory_space<vmem>>, vector<16x128xf32>
    %c0_2 = arith.constant 0 : index
    %c0_3 = arith.constant 0 : index
    %4 = vector.load %arg2[%c0_2, %c0_3] : memref<16x128xf32, #tpu.memory_space<vmem>>, vector<16x128xf32>
    %5 = arith.subf %3, %4 : vector<16x128xf32>
    %6 = arith.mulf %5, %5 : vector<16x128xf32>
    %c0_4 = arith.constant 0 : index
    %c0_5 = arith.constant 0 : index
    %7 = vector.load %arg3[%c0_4, %c0_5] : memref<8x128xf32, #tpu.memory_space<vmem>>, vector<8x128xf32>
    %8 = vector.shape_cast %6 : vector<16x128xf32> to vector<2x8x128xf32>
    %cst = arith.constant dense<0.000000e+00> : vector<8x128xf32>
    %9 = vector.multi_reduction <add>, %8, %cst [0] : vector<2x8x128xf32> to vector<8x128xf32>
    %10 = arith.addf %7, %9 : vector<8x128xf32>
    %c0_6 = arith.constant 0 : index
    %c0_7 = arith.constant 0 : index
    %11 = vector.load %arg3[%c0_6, %c0_7] : memref<8x128xf32, #tpu.memory_space<vmem>>, vector<8x128xf32>
    tpu.vector_store %arg3[%c0_6, %c0_7], %10 {strides = array<i32>} : memref<8x128xf32, #tpu.memory_space<vmem>>, vector<8x128xf32>,
    return
  }
  func.func @transform_0(%arg0: i32) -> (i32, i32) {
    %c0_i32 = arith.constant 0 : i32
    %c0_i32_0 = arith.constant 0 : i32
    return %arg0, %c0_i32 : i32, i32
  }
  func.func @transform_1(%arg0: i32) -> (i32, i32) {
    %c0_i32 = arith.constant 0 : i32
    %c0_i32_0 = arith.constant 0 : i32
    return %arg0, %c0_i32 : i32, i32
  }
  func.func @transform_2(%arg0: i32) -> (i32, i32) {
    %c0_i32 = arith.constant 0 : i32
    %c0_i32_0 = arith.constant 0 : i32
    %c0_i32_1 = arith.constant 0 : i32
    return %c0_i32, %c0_i32_0 : i32, i32
  }
}

</mosaic_0001>

<bundles_post_ra>
// kernel: _image_mse_loss.1
= control target key start
LH: loop header
LB: loop body
LE: loop exit
PB: predicated region body
PF: predicated region fallthrough
CT: control target
= control target key end

     0   :  { %s63_s0 = inlined_call_operand.vmem [shape: f32[16,128], index: 0, kind: input, shape index: {}]   ;;  %s64_s1 = inlined_call_operand.vmem [shape: f32[16,128], index: 1, kind: input, shape index: {}]   ;;  %s65_s2 = inlined_call_operand.vmem [shape: f32[8,128], index: 2, kind: output, shape index: {}]  }
   0x1   :  { %v16_v0 = vld [vmem:[%s63_s0] sm:$0xff]  ;;  %v17_v1 = vld [vmem:[%s63_s0 + $0x8] sm:$0xff] }
   0x2   :  { %v18_v2 = vld [vmem:[%s64_s1] sm:$0xff]  ;;  %v19_v3 = vld [vmem:[%s64_s1 + $0x8] sm:$0xff] }
   0x3   :  { %v20_v4 = vsub.f32 %v16_v0, %v18_v2  ;;  %v21_v5 = vsub.f32 %v17_v1, %v19_v3 }
   0x5   :  { %v22_v6 = vmul.f32 %v20_v4, %v20_v4  ;;  %v23_v7 = vmul.f32 %v21_v5, %v21_v5 }
   0x7   :  { %v25_v8 = vadd.f32 %v23_v7, %v22_v6 }
   0x9   :  { %27 = vst [vmem:[%s65_s2] sm:$0xff] %v25_v8 }

</bundles_post_ra>
